<compile_context>
chip_gen: v5e
topology: v5e:2x2
jax: 0.10.0
libtpu: 0.0.40
codegen_flags: <defaults>
</compile_context>

<pallas_src>
import functools

import jax
import jax.numpy as jnp
from jax.experimental import pallas as pl
from jax.experimental.pallas import tpu as pltpu


def _fp_kernel(poss_ref, post_ref, x_ref, xs_ref, brow_ref, bcol_ref,
               w1a_ref, w1b_ref, b1_ref, w2_ref, b2_ref, out_ref, *, k):
    ps = poss_ref[...]                                   # [TM,8] target coords (f32, zero-padded)
    pt = post_ref[...]                                   # [8,Np] source coords (f32, transposed)
    tm = ps.shape[0]
    n = pt.shape[1]

    # Pairwise squared distances [TM,Np] = |ps|^2 + |p|^2 - 2 ps.p   (cross term on MXU)
    sq_ps = jnp.sum(ps * ps, axis=1, keepdims=True)                        # [TM,1]
    sq_p = jnp.sum(pt * pt, axis=0, keepdims=True)                         # [1,Np]
    cross = jnp.dot(ps, pt, preferred_element_type=jnp.float32)            # [TM,Np]
    d2 = jnp.maximum(sq_ps + sq_p - 2.0 * cross, 0.0)

    # Mask cross-batch pairs (knn is restricted to matching batch ids). Padded sources carry
    # batch id -2 and padded targets -1, so padding can never be selected.
    same = bcol_ref[...] == brow_ref[...]                                  # [TM,Np]
    d2 = jnp.where(same, d2, jnp.inf)

    col = jax.lax.broadcasted_iota(jnp.int32, (1, n), 1)                   # [1,Np] (broadcast)

    # k rounds of (min, first-argmin) selection; accumulate ONE weighted one-hot matrix and
    # the weight sum, then gather with a single matmul afterwards (identical math).
    def body(_, carry):
        d2_c, wacc, accw = carry
        mn = jnp.min(d2_c, axis=1, keepdims=True)                          # [TM,1]
        am = jnp.min(jnp.where(d2_c == mn, col, n), axis=1, keepdims=True) # first argmin
        onehot = col == am                                                  # [TM,Np]
        w = 1.0 / jnp.maximum(mn, 1e-16)      # == 1 / clamp(d2, min=1e-16) in torch
        # mn == inf (fewer than k same-batch sources) gives w == 0 -> no contribution.
        wacc = wacc + jnp.where(onehot, w, 0.0)
        accw = accw + w
        d2_c = jnp.where(onehot, jnp.inf, d2_c)   # remove chosen neighbor for next round
        return d2_c, wacc, accw

    init = (d2, jnp.zeros((tm, n), jnp.float32), jnp.zeros((tm, 1), jnp.float32))
    _, wacc, accw = jax.lax.fori_loop(0, k, body, init, unroll=True)

    # Normalize BEFORE the gather matmul so the operand can be bf16 (weights <= 1).
    # Guard: a target with no same-batch source would give 0/0; clamp the denominator.
    inv_w = 1.0 / jnp.maximum(accw, 1e-16)                                  # [TM,1]
    wnorm = (wacc * inv_w).astype(jnp.bfloat16)                             # [TM,Np] bf16
    y = jnp.dot(wnorm, x_ref[...], preferred_element_type=jnp.float32)      # [TM,Cp] f32

    # cat([y, x_skip], dim=1) @ W1 expressed as split matmuls (identical math).
    # MLP matmuls on bf16 operands, f32 accumulation; biases / ReLU in f32.
    h = (jnp.dot(y.astype(jnp.bfloat16), w1a_ref[...],
                 preferred_element_type=jnp.float32)
         + jnp.dot(xs_ref[...], w1b_ref[...],
                   preferred_element_type=jnp.float32)
         + b1_ref[...])
    h = jnp.maximum(h, 0.0)
    o = jnp.dot(h.astype(jnp.bfloat16), w2_ref[...],
                preferred_element_type=jnp.float32) + b2_ref[...]
    out_ref[...] = jnp.maximum(o, 0.0).astype(out_ref.dtype)


def _round_up(v, m):
    return ((v + m - 1) // m) * m


def fp_module_forward(x, pos, batch, seed_idx, x_skip, pos_skip, batch_skip,
                      seed_idx_skip, params, *, k, tm=None):
    """Pallas implementation of FPModule.forward. Returns (x, pos_skip, batch_skip, None)."""
    del seed_idx, seed_idx_skip  # unused by FPModule.forward
    N, C = x.shape
    M = pos_skip.shape[0]
    Cs = x_skip.shape[1]
    w1, b1, w2, b2 = params
    H = w1.shape[1]
    Cout = w2.shape[1]

    LANE = 128
    Cp, Csp, Hp, Coutp = (_round_up(d, LANE) for d in (C, Cs, H, Cout))
    Np = _round_up(N, LANE)                  # lane-dense [TM,N] slabs / reductions

    # Generation-aware default target-row tile: v6e's MXU is 2x256 so TM=256 fills it;
    # 128 elsewhere (v5e MXU is 128-wide; v7x keeps per-TC VMEM pressure lower).
    if tm is None:
        tm = 128
        try:
            if "v6" in jax.devices()[0].device_kind.lower():
                tm = 256
        except Exception:
            pass

    TM = min(tm, _round_up(M, 8))            # tile of target rows (multiple of 8 sublanes)
    if _round_up(M, TM) // TM < 2:
        # Guarantee >= 2 grid steps so the "parallel" M axis can shard across v7x's two TCs.
        TM = max(8, _round_up((M + 1) // 2, 8))
    Mp = _round_up(M, TM)

    # Zero-pad features / weights to lane-dense widths (math unchanged: padded rows/cols
    # are zero so they contribute nothing; padding is sliced off below). Padded target
    # rows get batch id -1 and padded source columns batch id -2 so they never match.
    xf = jnp.zeros((Np, Cp), jnp.bfloat16).at[:N, :C].set(x.astype(jnp.bfloat16))
    xsf = jnp.zeros((Mp, Csp), jnp.bfloat16).at[:M, :Cs].set(x_skip.astype(jnp.bfloat16))
    possf = jnp.zeros((Mp, 8), jnp.float32).at[:M, :3].set(pos_skip.astype(jnp.float32))
    pos_t = jnp.zeros((8, Np), jnp.float32).at[:3, :N].set(pos.T.astype(jnp.float32))
    brow = jnp.full((1, Np), -2, jnp.int32).at[:, :N].set(
        batch.astype(jnp.int32).reshape(1, N))
    bcol = jnp.full((Mp, 1), -1, jnp.int32).at[:M, 0].set(batch_skip.astype(jnp.int32))

    # Split W1 so the kernel avoids an in-kernel lane concat (concat+matmul == split matmuls).
    w1a = jnp.zeros((Cp, Hp), jnp.bfloat16).at[:C, :H].set(w1[:C].astype(jnp.bfloat16))
    w1b = jnp.zeros((Csp, Hp), jnp.bfloat16).at[:Cs, :H].set(
        w1[C:C + Cs].astype(jnp.bfloat16))
    b1p = jnp.zeros((1, Hp), jnp.float32).at[:, :H].set(b1.astype(jnp.float32))
    w2p = jnp.zeros((Hp, Coutp), jnp.bfloat16).at[:H, :Cout].set(w2.astype(jnp.bfloat16))
    b2p = jnp.zeros((1, Coutp), jnp.float32).at[:, :Cout].set(b2.astype(jnp.float32))

    tile_m = lambda i: (i, 0)   # tiled along target rows
    const = lambda i: (0, 0)    # VMEM-resident across all grid steps
    resident = pl.Buffered(1)   # constant blocks: don't allocate a second (double) buffer

    # Generation-aware VMEM budget: actual footprint with headroom, capped below physical.
    bytes_resident = (pos_t.size * 4 + xf.size * 2 + brow.size * 4
                      + (w1a.size + w1b.size + w2p.size) * 2
                      + (b1p.size + b2p.size) * 4)
    bytes_tiles = 2 * (TM * 8 * 4 + TM * Csp * 2 + TM * 4 + TM * Coutp * 4)
    bytes_slabs = 7 * TM * Np * 4 + TM * (Cp + Hp) * 4        # d2/wacc/onehot/compares etc.
    need = bytes_resident + bytes_tiles + bytes_slabs
    try:
        phys_vmem = pltpu.get_tpu_info().vmem_capacity_bytes   # 128 MiB v5e/v6e, 64 MiB v7x
    except Exception:
        phys_vmem = 64 * 1024 * 1024
    vmem_cap = max(32 * 1024 * 1024, int(phys_vmem * 0.8))
    vmem_limit = int(max(32 * 1024 * 1024, min(vmem_cap, 2 * need)))

    flops = int(2 * Mp * Np * 8 + 5 * k * Mp * Np + 2 * Mp * Np * Cp
                + 2 * Mp * (Cp * Hp + Csp * Hp + Hp * Coutp))
    bytes_accessed = int(bytes_resident + xsf.size * 2 + possf.size * 4
                         + bcol.size * 4 + Mp * Coutp * 4)

    kern = functools.partial(_fp_kernel, k=k)
    out = pl.pallas_call(
        kern,
        out_shape=jax.ShapeDtypeStruct((Mp, Coutp), jnp.float32),
        grid_spec=pltpu.PrefetchScalarGridSpec(
            num_scalar_prefetch=0,
            grid=(Mp // TM,),
            in_specs=[
                pl.BlockSpec((TM, 8), tile_m),                                # pos_skip tile
                pl.BlockSpec((8, Np), const, pipeline_mode=resident),         # pos^T (resident)
                pl.BlockSpec((Np, Cp), const, pipeline_mode=resident),        # x bf16 (resident)
                pl.BlockSpec((TM, Csp), tile_m),                              # x_skip tile
                pl.BlockSpec((1, Np), const, pipeline_mode=resident),         # batch row
                pl.BlockSpec((TM, 1), tile_m),                                # batch_skip col
                pl.BlockSpec((Cp, Hp), const, pipeline_mode=resident),        # W1a
                pl.BlockSpec((Csp, Hp), const, pipeline_mode=resident),       # W1b
                pl.BlockSpec((1, Hp), const, pipeline_mode=resident),         # b1
                pl.BlockSpec((Hp, Coutp), const, pipeline_mode=resident),     # W2
                pl.BlockSpec((1, Coutp), const, pipeline_mode=resident),      # b2
            ],
            out_specs=pl.BlockSpec((TM, Coutp), tile_m),
        ),
        compiler_params=pltpu.CompilerParams(
            dimension_semantics=("parallel",),       # shard M tiles across TCs on v7x
            vmem_limit_bytes=vmem_limit,
        ),
        cost_estimate=pl.CostEstimate(flops=flops, transcendentals=0,
                                      bytes_accessed=bytes_accessed),
    )(possf, pos_t, xf, xsf, brow, bcol, w1a, w1b, b1p, w2p, b2p)

    return out[:M, :Cout], pos_skip, batch_skip, None


def _reference(x, pos, batch, x_skip, pos_skip, batch_skip, params, k):
    """Pure-JAX f32 reference with identical selection semantics."""
    w1, b1, w2, b2 = params
    d2 = jnp.sum((pos_skip[:, None, :] - pos[None, :, :]) ** 2, axis=-1)
    d2 = jnp.where(batch_skip[:, None] == batch[None, :], d2, jnp.inf)
    M, N = d2.shape
    col = jnp.arange(N)[None, :]
    acc_f = jnp.zeros((M, x.shape[1]), jnp.float32)
    acc_w = jnp.zeros((M, 1), jnp.float32)
    for _ in range(k):
        mn = jnp.min(d2, axis=1, keepdims=True)
        am = jnp.min(jnp.where(d2 == mn, col, N), axis=1, keepdims=True)
        onehot = col == am
        w = 1.0 / jnp.maximum(mn, 1e-16)
        acc_f = acc_f + w * (onehot.astype(jnp.float32) @ x)
        acc_w = acc_w + w
        d2 = jnp.where(onehot, jnp.inf, d2)
    y = jnp.concatenate([acc_f / acc_w, x_skip], axis=1)
    h = jnp.maximum(y @ w1 + b1, 0.0)
    return jnp.maximum(h @ w2 + b2, 0.0)


if __name__ == "__main__":
    key = jax.random.PRNGKey(0)
    k = 3
    N, M = 16, 32        # source points / target (skip) points
    C, Cs = 16, 8        # interpolated feature dim / skip feature dim
    H, Cout = 32, 16     # MLP hidden / output (nn = MLP([C+Cs, H, Cout]))

    ks = jax.random.split(key, 8)
    pos = jax.random.normal(ks[0], (N, 3), jnp.float32)
    pos_skip = jax.random.normal(ks[1], (M, 3), jnp.float32)
    x = jax.random.normal(ks[2], (N, C), jnp.float32)
    x_skip = jax.random.normal(ks[3], (M, Cs), jnp.float32)
    batch = jnp.concatenate(
        [jnp.zeros(N // 2, jnp.int32), jnp.ones(N - N // 2, jnp.int32)])
    batch_skip = jnp.concatenate(
        [jnp.zeros(M // 2, jnp.int32), jnp.ones(M - M // 2, jnp.int32)])

    # Deterministic parameters for the injected `nn` MLP (Linear+ReLU, Linear+ReLU).
    # TODO(synk): torch_geometric's MLP() also inserts BatchNorm; `nn` is injected, so
    # we instantiate the plain Linear+ReLU variant here.
    w1 = jax.random.normal(ks[4], (C + Cs, H), jnp.float32) * 0.1
    b1 = jax.random.normal(ks[5], (1, H), jnp.float32) * 0.01
    w2 = jax.random.normal(ks[6], (H, Cout), jnp.float32) * 0.1
    b2 = jax.random.normal(ks[7], (1, Cout), jnp.float32) * 0.01

    out, pos_out, batch_out, none_out = fp_module_forward(
        x, pos, batch, None, x_skip, pos_skip, batch_skip, None,
        (w1, b1, w2, b2), k=k)
    jax.block_until_ready(out)
    assert out.shape == (M, Cout)
    assert none_out is None
    assert bool(jnp.all(jnp.isfinite(out)))

    # Correctness vs. full-precision reference (loose tol: gather + MLP run bf16 in-kernel).
    ref = _reference(x, pos, batch, x_skip, pos_skip, batch_skip, (w1, b1, w2, b2), k)
    assert bool(jnp.allclose(out, ref, rtol=0.1, atol=0.1))
    print("KERNEL_OK")
</pallas_src>

<mosaic_0001>
module attributes {stable_mosaic.version = 11 : i64} {
  func.func @_fp_kernel(%arg0: i32, %arg1: memref<16x8xf32, #tpu.memory_space<vmem>>, %arg2: memref<8x128xf32, #tpu.memory_space<vmem>>, %arg3: memref<128x128xbf16, #tpu.memory_space<vmem>>, %arg4: memref<16x128xbf16, #tpu.memory_space<vmem>>, %arg5: memref<1x128xi32, #tpu.memory_space<vmem>>, %arg6: memref<16x1xi32, #tpu.memory_space<vmem>>, %arg7: memref<128x128xbf16, #tpu.memory_space<vmem>>, %arg8: memref<128x128xbf16, #tpu.memory_space<vmem>>, %arg9: memref<1x128xf32, #tpu.memory_space<vmem>>, %arg10: memref<128x128xbf16, #tpu.memory_space<vmem>>, %arg11: memref<1x128xf32, #tpu.memory_space<vmem>>, %arg12: memref<16x128xf32, #tpu.memory_space<vmem>>) attributes {dimension_semantics = [#tpu.dimension_semantics<parallel>], iteration_bounds = array<i64: 2>, scalar_prefetch = 0 : i64, scratch_operands = 0 : i64, tpu.core_type = #tpu.core_type<tc>, window_params = [{transform_indices = @transform_0, window_bounds = array<i64: 16, 8>}, {pipeline_mode = #tpu.pipeline_mode<synchronous>, transform_indices = @transform_1, window_bounds = array<i64: 8, 128>}, {pipeline_mode = #tpu.pipeline_mode<synchronous>, transform_indices = @transform_2, window_bounds = array<i64: 128, 128>}, {transform_indices = @transform_3, window_bounds = array<i64: 16, 128>}, {pipeline_mode = #tpu.pipeline_mode<synchronous>, transform_indices = @transform_4, window_bounds = array<i64: 1, 128>}, {transform_indices = @transform_5, window_bounds = array<i64: 16, 1>}, {pipeline_mode = #tpu.pipeline_mode<synchronous>, transform_indices = @transform_6, window_bounds = array<i64: 128, 128>}, {pipeline_mode = #tpu.pipeline_mode<synchronous>, transform_indices = @transform_7, window_bounds = array<i64: 128, 128>}, {pipeline_mode = #tpu.pipeline_mode<synchronous>, transform_indices = @transform_8, window_bounds = array<i64: 1, 128>}, {pipeline_mode = #tpu.pipeline_mode<synchronous>, transform_indices = @transform_9, window_bounds = array<i64: 128, 128>}, {pipeline_mode = #tpu.pipeline_mode<synchronous>, transform_indices = @transform_10, window_bounds = array<i64: 1, 128>}, {transform_indices = @transform_11, window_bounds = array<i64: 16, 128>}]} {
    %c0 = arith.constant 0 : index
    %c0_0 = arith.constant 0 : index
    %0 = vector.load %arg1[%c0, %c0_0] : memref<16x8xf32, #tpu.memory_space<vmem>>, vector<16x8xf32>
    %c0_1 = arith.constant 0 : index
    %c0_2 = arith.constant 0 : index
    %1 = vector.load %arg2[%c0_1, %c0_2] : memref<8x128xf32, #tpu.memory_space<vmem>>, vector<8x128xf32>
    %2 = arith.mulf %0, %0 : vector<16x8xf32>
    %cst = arith.constant dense<0.000000e+00> : vector<16xf32>
    %3 = vector.multi_reduction <add>, %2, %cst [1] : vector<16x8xf32> to vector<16xf32>
    %4 = vector.shape_cast %3 : vector<16xf32> to vector<16x1xf32>
    %5 = arith.mulf %1, %1 : vector<8x128xf32>
    %cst_3 = arith.constant dense<0.000000e+00> : vector<128xf32>
    %6 = vector.multi_reduction <add>, %5, %cst_3 [0] : vector<8x128xf32> to vector<128xf32>
    %7 = vector.shape_cast %6 : vector<128xf32> to vector<1x128xf32>
    %cst_4 = arith.constant dense<0.000000e+00> : vector<16x128xf32>
    %8 = tpu.matmul %0, %1, %cst_4 {dimension_numbers = #tpu.dot_dimension_numbers<[1], [0], [0], [1], [0, 0, 1, 1], [], []>} : vector<16x8xf32>, vector<8x128xf32>, vector<16x128xf32> -> vector<16x128xf32>
    %9 = vector.broadcast %4 : vector<16x1xf32> to vector<16x128xf32>
    %10 = vector.broadcast %7 : vector<1x128xf32> to vector<16x128xf32>
    %11 = arith.addf %9, %10 : vector<16x128xf32>
    %cst_5 = arith.constant 2.000000e+00 : f32
    %12 = vector.broadcast %cst_5 : f32 to vector<16x128xf32>
    %13 = arith.mulf %12, %8 : vector<16x128xf32>
    %14 = arith.subf %11, %13 : vector<16x128xf32>
    %cst_6 = arith.constant 0.000000e+00 : f32
    %15 = vector.broadcast %cst_6 : f32 to vector<16x128xf32>
    %16 = arith.maximumf %14, %15 : vector<16x128xf32>
    %c0_7 = arith.constant 0 : index
    %c0_8 = arith.constant 0 : index
    %17 = vector.load %arg6[%c0_7, %c0_8] : memref<16x1xi32, #tpu.memory_space<vmem>>, vector<16x1xi32>
    %c0_9 = arith.constant 0 : index
    %c0_10 = arith.constant 0 : index
    %18 = vector.load %arg5[%c0_9, %c0_10] : memref<1x128xi32, #tpu.memory_space<vmem>>, vector<1x128xi32>
    %19 = vector.broadcast %17 : vector<16x1xi32> to vector<16x128xi32>
    %20 = vector.broadcast %18 : vector<1x128xi32> to vector<16x128xi32>
    %21 = arith.cmpi eq, %19, %20 : vector<16x128xi32>
    %cst_11 = arith.constant 0x7F800000 : f32
    %22 = vector.broadcast %cst_11 : f32 to vector<16x128xf32>
    %23 = arith.select %21, %16, %22 : vector<16x128xi1>, vector<16x128xf32>
    %24 = tpu.iota {dimensions = array<i32: 1>} : vector<1x128xi32>
    %cst_12 = arith.constant 0.000000e+00 : f32
    %25 = vector.broadcast %cst_12 : f32 to vector<16x128xf32>
    %cst_13 = arith.constant 0.000000e+00 : f32
    %26 = vector.broadcast %cst_13 : f32 to vector<16x1xf32>
    %c0_i32 = arith.constant 0 : i32
    %cst_14 = arith.constant dense<0x7F800000> : vector<16xf32>
    %27 = vector.multi_reduction <minimumf>, %23, %cst_14 [1] : vector<16x128xf32> to vector<16xf32>
    %28 = vector.shape_cast %27 : vector<16xf32> to vector<16x1xf32>
    %29 = vector.broadcast %28 : vector<16x1xf32> to vector<16x128xf32>
    %30 = arith.cmpf oeq, %23, %29 : vector<16x128xf32>
    %c128_i32 = arith.constant 128 : i32
    %31 = vector.shape_cast %24 : vector<1x128xi32> to vector<1x128xi32>
    %32 = vector.broadcast %31 : vector<1x128xi32> to vector<16x128xi32>
    %33 = vector.broadcast %c128_i32 : i32 to vector<16x128xi32>
    %34 = arith.select %30, %32, %33 : vector<16x128xi1>, vector<16x128xi32>
    %cst_15 = arith.constant dense<2147483647> : vector<16xi32>
    %35 = vector.multi_reduction <minsi>, %34, %cst_15 [1] : vector<16x128xi32> to vector<16xi32>
    %36 = vector.shape_cast %35 : vector<16xi32> to vector<16x1xi32>
    %37 = vector.broadcast %24 : vector<1x128xi32> to vector<16x128xi32>
    %38 = vector.broadcast %36 : vector<16x1xi32> to vector<16x128xi32>
    %39 = arith.cmpi eq, %37, %38 : vector<16x128xi32>
    %cst_16 = arith.constant 1.000000e-16 : f32
    %40 = vector.broadcast %cst_16 : f32 to vector<16x1xf32>
    %41 = arith.maximumf %28, %40 : vector<16x1xf32>
    %cst_17 = arith.constant 1.000000e+00 : f32
    %42 = vector.broadcast %cst_17 : f32 to vector<16x1xf32>
    %43 = arith.divf %42, %41 : vector<16x1xf32>
    %cst_18 = arith.constant 0.000000e+00 : f32
    %44 = vector.shape_cast %43 : vector<16x1xf32> to vector<16x1xf32>
    %45 = vector.broadcast %44 : vector<16x1xf32> to vector<16x128xf32>
    %46 = vector.broadcast %cst_18 : f32 to vector<16x128xf32>
    %47 = arith.select %39, %45, %46 : vector<16x128xi1>, vector<16x128xf32>
    %48 = arith.addf %25, %47 : vector<16x128xf32>
    %49 = arith.addf %26, %43 : vector<16x1xf32>
    %cst_19 = arith.constant 0x7F800000 : f32
    %50 = vector.broadcast %cst_19 : f32 to vector<16x128xf32>
    %51 = arith.select %39, %50, %23 : vector<16x128xi1>, vector<16x128xf32>
    %c1_i32 = arith.constant 1 : i32
    %cst_20 = arith.constant dense<0x7F800000> : vector<16xf32>
    %52 = vector.multi_reduction <minimumf>, %51, %cst_20 [1] : vector<16x128xf32> to vector<16xf32>
    %53 = vector.shape_cast %52 : vector<16xf32> to vector<16x1xf32>
    %54 = vector.broadcast %53 : vector<16x1xf32> to vector<16x128xf32>
    %55 = arith.cmpf oeq, %51, %54 : vector<16x128xf32>
    %c128_i32_21 = arith.constant 128 : i32
    %56 = vector.shape_cast %24 : vector<1x128xi32> to vector<1x128xi32>
    %57 = vector.broadcast %56 : vector<1x128xi32> to vector<16x128xi32>
    %58 = vector.broadcast %c128_i32_21 : i32 to vector<16x128xi32>
    %59 = arith.select %55, %57, %58 : vector<16x128xi1>, vector<16x128xi32>
    %cst_22 = arith.constant dense<2147483647> : vector<16xi32>
    %60 = vector.multi_reduction <minsi>, %59, %cst_22 [1] : vector<16x128xi32> to vector<16xi32>
    %61 = vector.shape_cast %60 : vector<16xi32> to vector<16x1xi32>
    %62 = vector.broadcast %24 : vector<1x128xi32> to vector<16x128xi32>
    %63 = vector.broadcast %61 : vector<16x1xi32> to vector<16x128xi32>
    %64 = arith.cmpi eq, %62, %63 : vector<16x128xi32>
    %cst_23 = arith.constant 1.000000e-16 : f32
    %65 = vector.broadcast %cst_23 : f32 to vector<16x1xf32>
    %66 = arith.maximumf %53, %65 : vector<16x1xf32>
    %cst_24 = arith.constant 1.000000e+00 : f32
    %67 = vector.broadcast %cst_24 : f32 to vector<16x1xf32>
    %68 = arith.divf %67, %66 : vector<16x1xf32>
    %cst_25 = arith.constant 0.000000e+00 : f32
    %69 = vector.shape_cast %68 : vector<16x1xf32> to vector<16x1xf32>
    %70 = vector.broadcast %69 : vector<16x1xf32> to vector<16x128xf32>
    %71 = vector.broadcast %cst_25 : f32 to vector<16x128xf32>
    %72 = arith.select %64, %70, %71 : vector<16x128xi1>, vector<16x128xf32>
    %73 = arith.addf %48, %72 : vector<16x128xf32>
    %74 = arith.addf %49, %68 : vector<16x1xf32>
    %cst_26 = arith.constant 0x7F800000 : f32
    %75 = vector.broadcast %cst_26 : f32 to vector<16x128xf32>
    %76 = arith.select %64, %75, %51 : vector<16x128xi1>, vector<16x128xf32>
    %c2_i32 = arith.constant 2 : i32
    %cst_27 = arith.constant dense<0x7F800000> : vector<16xf32>
    %77 = vector.multi_reduction <minimumf>, %76, %cst_27 [1] : vector<16x128xf32> to vector<16xf32>
    %78 = vector.shape_cast %77 : vector<16xf32> to vector<16x1xf32>
    %79 = vector.broadcast %78 : vector<16x1xf32> to vector<16x128xf32>
    %80 = arith.cmpf oeq, %76, %79 : vector<16x128xf32>
    %c128_i32_28 = arith.constant 128 : i32
    %81 = vector.shape_cast %24 : vector<1x128xi32> to vector<1x128xi32>
    %82 = vector.broadcast %81 : vector<1x128xi32> to vector<16x128xi32>
    %83 = vector.broadcast %c128_i32_28 : i32 to vector<16x128xi32>
    %84 = arith.select %80, %82, %83 : vector<16x128xi1>, vector<16x128xi32>
    %cst_29 = arith.constant dense<2147483647> : vector<16xi32>
    %85 = vector.multi_reduction <minsi>, %84, %cst_29 [1] : vector<16x128xi32> to vector<16xi32>
    %86 = vector.shape_cast %85 : vector<16xi32> to vector<16x1xi32>
    %87 = vector.broadcast %24 : vector<1x128xi32> to vector<16x128xi32>
    %88 = vector.broadcast %86 : vector<16x1xi32> to vector<16x128xi32>
    %89 = arith.cmpi eq, %87, %88 : vector<16x128xi32>
    %cst_30 = arith.constant 1.000000e-16 : f32
    %90 = vector.broadcast %cst_30 : f32 to vector<16x1xf32>
    %91 = arith.maximumf %78, %90 : vector<16x1xf32>
    %cst_31 = arith.constant 1.000000e+00 : f32
    %92 = vector.broadcast %cst_31 : f32 to vector<16x1xf32>
    %93 = arith.divf %92, %91 : vector<16x1xf32>
    %cst_32 = arith.constant 0.000000e+00 : f32
    %94 = vector.shape_cast %93 : vector<16x1xf32> to vector<16x1xf32>
    %95 = vector.broadcast %94 : vector<16x1xf32> to vector<16x128xf32>
    %96 = vector.broadcast %cst_32 : f32 to vector<16x128xf32>
    %97 = arith.select %89, %95, %96 : vector<16x128xi1>, vector<16x128xf32>
    %98 = arith.addf %73, %97 : vector<16x128xf32>
    %99 = arith.addf %74, %93 : vector<16x1xf32>
    %cst_33 = arith.constant 0x7F800000 : f32
    %100 = vector.broadcast %cst_33 : f32 to vector<16x128xf32>
    %101 = arith.select %89, %100, %76 : vector<16x128xi1>, vector<16x128xf32>
    %cst_34 = arith.constant 1.000000e-16 : f32
    %102 = vector.broadcast %cst_34 : f32 to vector<16x1xf32>
    %103 = arith.maximumf %99, %102 : vector<16x1xf32>
    %cst_35 = arith.constant 1.000000e+00 : f32
    %104 = vector.broadcast %cst_35 : f32 to vector<16x1xf32>
    %105 = arith.divf %104, %103 : vector<16x1xf32>
    %106 = vector.broadcast %105 : vector<16x1xf32> to vector<16x128xf32>
    %107 = arith.mulf %98, %106 : vector<16x128xf32>
    %108 = arith.truncf %107 : vector<16x128xf32> to vector<16x128xbf16>
    %c0_36 = arith.constant 0 : index
    %c0_37 = arith.constant 0 : index
    %109 = vector.load %arg3[%c0_36, %c0_37] : memref<128x128xbf16, #tpu.memory_space<vmem>>, vector<128x128xbf16>
    %cst_38 = arith.constant dense<0.000000e+00> : vector<16x128xf32>
    %110 = tpu.matmul %108, %109, %cst_38 {dimension_numbers = #tpu.dot_dimension_numbers<[1], [0], [0], [1], [0, 0, 1, 1], [], []>} : vector<16x128xbf16>, vector<128x128xbf16>, vector<16x128xf32> -> vector<16x128xf32>
    %111 = arith.truncf %110 : vector<16x128xf32> to vector<16x128xbf16>
    %c0_39 = arith.constant 0 : index
    %c0_40 = arith.constant 0 : index
    %112 = vector.load %arg7[%c0_39, %c0_40] : memref<128x128xbf16, #tpu.memory_space<vmem>>, vector<128x128xbf16>
    %cst_41 = arith.constant dense<0.000000e+00> : vector<16x128xf32>
    %113 = tpu.matmul %111, %112, %cst_41 {dimension_numbers = #tpu.dot_dimension_numbers<[1], [0], [0], [1], [0, 0, 1, 1], [], []>} : vector<16x128xbf16>, vector<128x128xbf16>, vector<16x128xf32> -> vector<16x128xf32>
    %c0_42 = arith.constant 0 : index
    %c0_43 = arith.constant 0 : index
    %114 = vector.load %arg4[%c0_42, %c0_43] : memref<16x128xbf16, #tpu.memory_space<vmem>>, vector<16x128xbf16>
    %c0_44 = arith.constant 0 : index
    %c0_45 = arith.constant 0 : index
    %115 = vector.load %arg8[%c0_44, %c0_45] : memref<128x128xbf16, #tpu.memory_space<vmem>>, vector<128x128xbf16>
    %cst_46 = arith.constant dense<0.000000e+00> : vector<16x128xf32>
    %116 = tpu.matmul %114, %115, %cst_46 {dimension_numbers = #tpu.dot_dimension_numbers<[1], [0], [0], [1], [0, 0, 1, 1], [], []>} : vector<16x128xbf16>, vector<128x128xbf16>, vector<16x128xf32> -> vector<16x128xf32>
    %117 = arith.addf %113, %116 : vector<16x128xf32>
    %c0_47 = arith.constant 0 : index
    %c0_48 = arith.constant 0 : index
    %118 = vector.load %arg9[%c0_47, %c0_48] : memref<1x128xf32, #tpu.memory_space<vmem>>, vector<1x128xf32>
    %119 = vector.broadcast %118 : vector<1x128xf32> to vector<16x128xf32>
    %120 = arith.addf %117, %119 : vector<16x128xf32>
    %cst_49 = arith.constant 0.000000e+00 : f32
    %121 = vector.broadcast %cst_49 : f32 to vector<16x128xf32>
    %122 = arith.maximumf %120, %121 : vector<16x128xf32>
    %123 = arith.truncf %122 : vector<16x128xf32> to vector<16x128xbf16>
    %c0_50 = arith.constant 0 : index
    %c0_51 = arith.constant 0 : index
    %124 = vector.load %arg10[%c0_50, %c0_51] : memref<128x128xbf16, #tpu.memory_space<vmem>>, vector<128x128xbf16>
    %cst_52 = arith.constant dense<0.000000e+00> : vector<16x128xf32>
    %125 = tpu.matmul %123, %124, %cst_52 {dimension_numbers = #tpu.dot_dimension_numbers<[1], [0], [0], [1], [0, 0, 1, 1], [], []>} : vector<16x128xbf16>, vector<128x128xbf16>, vector<16x128xf32> -> vector<16x128xf32>
    %c0_53 = arith.constant 0 : index
    %c0_54 = arith.constant 0 : index
    %126 = vector.load %arg11[%c0_53, %c0_54] : memref<1x128xf32, #tpu.memory_space<vmem>>, vector<1x128xf32>
    %127 = vector.broadcast %126 : vector<1x128xf32> to vector<16x128xf32>
    %128 = arith.addf %125, %127 : vector<16x128xf32>
    %cst_55 = arith.constant 0.000000e+00 : f32
    %129 = vector.broadcast %cst_55 : f32 to vector<16x128xf32>
    %130 = arith.maximumf %128, %129 : vector<16x128xf32>
    %c0_56 = arith.constant 0 : index
    %c0_57 = arith.constant 0 : index
    %131 = vector.load %arg12[%c0_56, %c0_57] : memref<16x128xf32, #tpu.memory_space<vmem>>, vector<16x128xf32>
    tpu.vector_store %arg12[%c0_56, %c0_57], %130 {strides = array<i32>} : memref<16x128xf32, #tpu.memory_space<vmem>>, vector<16x128xf32>,
    return
  }
  func.func @transform_0(%arg0: i32) -> (i32, i32) {
    %c0_i32 = arith.constant 0 : i32
    %c0_i32_0 = arith.constant 0 : i32
    return %arg0, %c0_i32 : i32, i32
  }
  func.func @transform_1(%arg0: i32) -> (i32, i32) {
    %c0_i32 = arith.constant 0 : i32
    %c0_i32_0 = arith.constant 0 : i32
    %c0_i32_1 = arith.constant 0 : i32
    return %c0_i32, %c0_i32_0 : i32, i32
  }
  func.func @transform_2(%arg0: i32) -> (i32, i32) {
    %c0_i32 = arith.constant 0 : i32
    %c0_i32_0 = arith.constant 0 : i32
    %c0_i32_1 = arith.constant 0 : i32
    return %c0_i32, %c0_i32_0 : i32, i32
  }
  func.func @transform_3(%arg0: i32) -> (i32, i32) {
    %c0_i32 = arith.constant 0 : i32
    %c0_i32_0 = arith.constant 0 : i32
    return %arg0, %c0_i32 : i32, i32
  }
  func.func @transform_4(%arg0: i32) -> (i32, i32) {
    %c0_i32 = arith.constant 0 : i32
    %c0_i32_0 = arith.constant 0 : i32
    %c0_i32_1 = arith.constant 0 : i32
    return %c0_i32, %c0_i32_0 : i32, i32
  }
  func.func @transform_5(%arg0: i32) -> (i32, i32) {
    %c0_i32 = arith.constant 0 : i32
    %c0_i32_0 = arith.constant 0 : i32
    return %arg0, %c0_i32 : i32, i32
  }
  func.func @transform_6(%arg0: i32) -> (i32, i32) {
    %c0_i32 = arith.constant 0 : i32
    %c0_i32_0 = arith.constant 0 : i32
    %c0_i32_1 = arith.constant 0 : i32
    return %c0_i32, %c0_i32_0 : i32, i32
  }
  func.func @transform_7(%arg0: i32) -> (i32, i32) {
    %c0_i32 = arith.constant 0 : i32
    %c0_i32_0 = arith.constant 0 : i32
    %c0_i32_1 = arith.constant 0 : i32
    return %c0_i32, %c0_i32_0 : i32, i32
  }
  func.func @transform_8(%arg0: i32) -> (i32, i32) {
    %c0_i32 = arith.constant 0 : i32
    %c0_i32_0 = arith.constant 0 : i32
    %c0_i32_1 = arith.constant 0 : i32
    return %c0_i32, %c0_i32_0 : i32, i32
  }
  func.func @transform_9(%arg0: i32) -> (i32, i32) {
    %c0_i32 = arith.constant 0 : i32
    %c0_i32_0 = arith.constant 0 : i32
    %c0_i32_1 = arith.constant 0 : i32
    return %c0_i32, %c0_i32_0 : i32, i32
  }
  func.func @transform_10(%arg0: i32) -> (i32, i32) {
    %c0_i32 = arith.constant 0 : i32
    %c0_i32_0 = arith.constant 0 : i32
    %c0_i32_1 = arith.constant 0 : i32
    return %c0_i32, %c0_i32_0 : i32, i32
  }
  func.func @transform_11(%arg0: i32) -> (i32, i32) {
    %c0_i32 = arith.constant 0 : i32
    %c0_i32_0 = arith.constant 0 : i32
    return %arg0, %c0_i32 : i32, i32
  }
}

</mosaic_0001>

<bundles_post_ra>
// kernel: tpu_custom_call.1
= control target key start
LH: loop header
LB: loop body
LE: loop exit
PB: predicated region body
PF: predicated region fallthrough
CT: control target
= control target key end

     0   :  { %s2195_s0 = inlined_call_operand.vmem [shape: f32[32,8], index: 0, kind: input, shape index: {}]   ;;  %s2196_s1 = inlined_call_operand.vmem [shape: f32[8,128], index: 1, kind: input, shape index: {}]   ;;  %s2197_s2 = inlined_call_operand.vmem [shape: bf16[128,128], index: 2, kind: input, shape index: {}]   ;;  %s2198_s3 = inlined_call_operand.hbm [shape: bf16[32,128], index: 3, kind: input, shape index: {}]   ;;  %s2199_s4 = inlined_call_operand.vmem [shape: s32[1,128], index: 4, kind: input, shape index: {}]   ;;  %s2200_s5 = inlined_call_operand.vmem [shape: s32[32,1], index: 5, kind: input, shape index: {}]   ;;  %s2201_s6 = inlined_call_operand.hbm [shape: bf16[128,128], index: 6, kind: input, shape index: {}]   ;;  %s2202_s7 = inlined_call_operand.hbm [shape: bf16[128,128], index: 7, kind: input, shape index: {}]   ;;  %s2203_s8 = inlined_call_operand.vmem [shape: f32[1,128], index: 8, kind: input, shape index: {}]   ;;  %s2204_s9 = inlined_call_operand.hbm [shape: bf16[128,128], index: 9, kind: input, shape index: {}]   ;;  %s2205_s10 = inlined_call_operand.vmem [shape: f32[1,128], index: 10, kind: input, shape index: {}]   ;;  %s2206_s11 = inlined_call_operand.hbm [shape: f32[32,128], index: 11, kind: output, shape index: {}]  }
   0x1   :  { %2210 = sst [smem:[#allocation17_spill]] %s2201_s6 }
   0x2   :  { %2211 = sst [smem:[#allocation18_spill]] %s2202_s7 }
   0x3   :  { %2212 = sst [smem:[#allocation19_spill]] %s2204_s9 }
   0x4   :  { %16 = vsyncpa [#allocation3], 0 }
   0x5   :  { %18 = vsyncpa [#allocation3 + $0x1], 0 }
   0x6   :  { %19 = vsyncpa [#allocation6], 0 }
   0x7   :  { %20 = vsyncpa [#allocation9], 0 }
   0x8   :  { %21 = vsyncpa [#allocation4], 0 }
   0x9   :  { %23 = vsyncpa [#allocation4 + $0x1], 0  ;;  %s1882_s17 = smov 0   ;;  %s1884_s18 = smov 0  }
   0xa   :  { %s1886_s19 = smov 0   ;;  %s1888_s20 = smov 0  }
   0xb LB: > { %2213 = sst [smem:[#allocation15_spill]] %s1808_s19  ;;  %s1903_s21 = sadd.s32 4294967295, %s1812_s20   ;;  %s1812_s20 = sphi %s1888_s20, %s2233_s20   ;;  %s1808_s19 = sphi %s1886_s19, %s2230_s19   ;;  %s1804_s18 = sphi %s1884_s18, %s2232_s18   ;;  %s1800_s17 = sphi %s1882_s17, %s2231_s17  }
   0xc   : > { %s1322_s22 = sadd.s32 4294967294, %s1812_s20   ;;  %p117_p0 = scmp.ne.s32.totalorder %s1804_s18, %s1800_s17 }
   0xd   : > { %p118_p1 = scmp.eq.s32.totalorder %s1903_s21, 0  ;;  %p293_p2 = scmp.eq.s32.totalorder %s1903_s21, 1 }
   0xe   : > { %p299_p3 = scmp.eq.s32.totalorder %s1322_s22, 1  ;;  %p1323_p5 = scmp.ge.s32.totalorder %s1812_s20, 1 }
   0xf   : > { %p1912_p4 = por %p118_p1, %p117_p0  ;;  %p306_p7 = scmp.lt.s32.totalorder %s1812_s20, 3 }
  0x10   : > { %p1917_p6 = por %p299_p3, %p117_p0  ;;  %s2216_s6 = sld [smem:[#allocation17_spill]] }
  0x11   : > { %p1925_p8 = pnand %p1323_p5, %p306_p7  ;;  %s1814_s29 = smov [#allocation5]  }
  0x12   : > { %s328_s30 = sshll.u32 %s1814_s29, 4  ;;  %s2219_s7 = sld [smem:[#allocation18_spill]]  ;;  %s329_s30 = int_to_ptr.vmem [resolvable:$true] %s328_s30 }
  0x13   : > { %p1531_p9 = pneg %p1925_p8  ;;  %s2207_s16 = smov 64  }
  0x14   : > { %s2208_s22 = smov 4   ;;  %s1817_s25 = smov [#allocation7]  }
  0x15   : > { %p1933_p10 = pnand %p1531_p9, %p118_p1  ;;  %s342_s26 = sshll.u32 %s1817_s25, 4  ;;  %s343_s26 = int_to_ptr.vmem [resolvable:$true] %s342_s26 }
  0x16   : > { %s326_s27 = sshll.u32 %s2216_s6, 4  ;;  %s2220_s9 = sld [smem:[#allocation19_spill]]  ;;  %s327_s27 = int_to_ptr.hbm [resolvable:$true] %s326_s27 }
  0x17   : > { %1534 = dma.hbm_to_vmem [thread:$0]  (!%p1933_p10), %s327_s27, 1024, %s329_s30, [#allocation6], %s2207_s16, %s2207_s16, %s2208_s22  }
  0x18   : > { %s340_s15 = sshll.u32 %s2219_s7, 4  ;;  %s1818_s27 = smov [#allocation8]   ;;  %s341_s15 = int_to_ptr.hbm [resolvable:$true] %s340_s15 }
  0x19   : > { %1537 = dma.hbm_to_vmem [thread:$0]  (!%p1933_p10), %s341_s15, 1024, %s343_s26, [#allocation6], %s2207_s16, %s2207_s16, %s2208_s22  }
  0x1a   : > { %s359_s30 = sshll.u32 %s1818_s27, 4  ;;  %s1955_s6 = sadd.s32 1, %s1812_s20   ;;  %s360_s30 = int_to_ptr.vmem [resolvable:$true] %s359_s30 }
  0x1b   : > { %s101_s25 = ssub.s32 %s1812_s20, %s1955_s6  ;;  %s104_s29 = sadd.s32 1, %s1808_s19 }
  0x1c   : > { %s357_s14 = sshll.u32 %s2220_s9, 4  ;;  %p102_p12 = scmp.eq.s32.totalorder %s101_s25, 0  ;;  %s358_s14 = int_to_ptr.hbm [resolvable:$true] %s357_s14 }
  0x1d   : > { %1540 = dma.hbm_to_vmem [thread:$0]  (!%p1933_p10), %s358_s14, 1024, %s360_s30, [#allocation9], %s2207_s16, %s2207_s16, %s2208_s22  }
  0x1e   : > { %p111_p13 = scmp.ne.s32.totalorder %s1808_s19, %s1804_s18  ;;  %p112_p0 = scmp.eq.s32.totalorder %s1812_s20, 0 }
  0x1f   : > { %s1969_s13 = scalar_select %p102_p12, %s1808_s19, %s104_s29  }
  0x20   : > { %p1973_p3 = por %p293_p2, %p111_p13  ;;  %p1552_p5 = scmp.lt.s32.totalorder %s1812_s20, 2 }
  0x21   : > { %2221 = sst [smem:[#allocation16_spill]] %s1969_s13  ;;  %s385_s26 = sand.u32 1, %s1808_s19  }
  0x22   : > { %s1480_s12 = sshll.u32 %s1812_s20, 3  ;;  %p113_p7 = por %p112_p0, %p111_p13 }
  0x23   : > { %s1328_s27 = sshll.u32 %s385_s26, 3  ;;  %s394_s14 = scalar_lea.hbm %s2198_s3, %s1480_s12 }
  0x24   : > { %s395_s30 = sshll.u32 %s394_s14, 4  ;;  %s389_s25 = scalar_lea.vmem [#allocation2], %s1328_s27  ;;  %s396_s30 = int_to_ptr.hbm [resolvable:$true] %s395_s30 }
  0x25   : > { %s397_s16 = sshll.u32 %s389_s25, 4  ;;  %p1983_p9 = pnand %p1552_p5, %p113_p7  ;;  %s398_s16 = int_to_ptr.vmem [resolvable:$true] %s397_s16 }
  0x26   : > { %s386_s22 = scalar_lea.sflag [#allocation3], %s385_s26  ;;  %s1708_s13 = sshra.s32 %s396_s30, 4  ;;  %s1709_s13 = int_to_ptr.hbm [resolvable:$true] %s1708_s13 }
  0x27   : > { %s1710_s19 = scalar_lea.hbm %s1709_s13, 8  ;;  %p1712_p10 = pneg %p1983_p9 }
  0x28   : > { %p1711_p2 = scmp.ne.s32.totalorder %s1709_s13, %s1710_s19  ;;  %s1715_s12 = scalar_lea.hbm %s2198_s3, 16 }
  0x29   : > { %p1716_p0 = scmp.lt.s32.totalorder %s1709_s13, %s2198_s3  ;;  %p1717_p5 = scmp.lt.s32.totalorder %s1715_s12, %s1710_s19 }
  0x2a   : > { %p1713_p12 = pnand %p1712_p10, %p1711_p2 }
  0x2b   : > { %p1718_p7 = por %p1717_p5, %p1716_p0 }
  0x2c   : > { %p1714_p13 = pneg %p1713_p12 }
  0x2e   : > { %p1719_p11 = pnand %p1718_p7, %p1714_p13 }
  0x30   : > { %1722 = shalt.err (!%p1719_p11)
}
  0x31   : > { %s2224_s26 = smov 4   ;;  %s2225_s25 = smov 64  }
  0x32   : > { %1544 = dma.hbm_to_vmem [thread:$0]  (!%p1983_p9), %s396_s30, 128, %s398_s16, %s386_s22, %s2225_s25, %s2225_s25, %s2224_s26  }
  0x33   : > { %418 = sbr.rel (%p1925_p8) target bundleno = 1727 (0x6bf), region = 64  ;;  %s2003_s7 = sand.u32 (!%p1925_p8), 1, %s1804_s18  }
  0x34   : > { %s1332_s13 = sshll.u32 (!%p1925_p8), %s2003_s7, 3  ;;  %s421_s19 = scalar_lea.sflag (!%p1925_p8), [#allocation3], %s2003_s7 }
  0x35   : > { %s2007_s9 = scalar_lea.vmem (!%p1925_p8), [#allocation2], %s1332_s13 }
  0x38   : > { %1783 = dma.done.wait (%p1912_p4), %s421_s19, 128  }
  0x39   : > { %1785 = vsyncadd (%p1912_p4), %s421_s19, 4294967168 }
  0x3a   : > { %1787 = dma.done.wait (%p118_p1), [#allocation6], 2048  }
  0x3b   : > { %1789 = vsyncadd (%p118_p1), [#allocation6], 4294965248 }
  0x3c   : > { %1791 = dma.done.wait (%p118_p1), [#allocation9], 1024  }
  0x3d   : > { %1793 = vsyncadd (%p118_p1), [#allocation9], 4294966272  ;;  %s1337_s28 = sshll.u32 %s1903_s21, 1  ;;  %v1819_v0 = vmov 0   ;;  %vm508_vm0 = vcmask 64512   ;;  %v505_v1 = vld [vmem:[%s2196_s1] sm:$0xff]  ;;  %v573_v34 = vlaneseq }
  0x3e   : > { %p490_p8 = scmp.lt.s32.totalorder %s1337_s28, 3  ;;  %1597 = vset.pattern.permute.xlu1 %v1819_v0  ;;  %1598 = vset.pattern.permute.xlu0 %v1819_v0  ;;  %v515_v10 = vmul.f32 %v505_v1, %v505_v1  ;;  %v1599_v19 = vld [vmem:[%s2199_s4] ss:$0 sm:$0xff]  ;;  %s1336_s29 = sshll.u32 %s2003_s7, 4 }
  0x3f   : > { %543 = vmatpush.msra.mxu0 %v505_v1  ;;  %v2038_v35 = vand.u32 127, %v573_v34  ;;  %s1514_s12 = sshll.u32 %s1903_s21, 4  ;;  %s488_s25 = scalar_lea.vmem [#allocation10], %s1336_s29 }
  0x40   : > { %s2235_s28 = smov (!%p490_p8, %s1337_s28), 3  ;;  %v516_v11 = vrot.slane %v515_v10, 4  ;;  %s1192_s26 = scalar_lea.hbm %s2206_s11, %s1514_s12 }
  0x41   : > { %s1338_s23 = sshll.u32 %s2235_s28, 3  ;;  %s1193_s13 = sshll.u32 %s488_s25, 4  ;;  %s1194_s13 = int_to_ptr.vmem [resolvable:$true] %s1193_s13 }
  0x42   : > { %s493_s30 = scalar_lea.vmem %s2195_s0, %s1338_s23  ;;  %s500_s27 = scalar_lea.vmem %s2200_s5, %s1338_s23  ;;  %v517_v12 = vadd.f32 %v516_v11, %v515_v10 }
  0x43   : > { %v503_v2 = vld [vmem:[%s493_s30] sm:$0xff]  ;;  %v504_v6 = vld [vmem:[%s493_s30 + $0x8] sm:$0xff]  ;;  %s1195_s19 = sshll.u32 %s1192_s26, 4  ;;  %s1181_s28 = scalar_lea.sflag [#allocation4], %s2003_s7  ;;  %s1196_s19 = int_to_ptr.hbm [resolvable:$true] %s1195_s19 }
  0x44   : > { %v559_v3 = vld [vmem:[%s500_s27] sm:$0xff]  ;;  %v506_v4 = vmul.f32 %v503_v2, %v503_v2  ;;  %1341 = vmatmul.msk.f32.vlgmr.msra.gmra.mxu0 %vm508_vm0, %v503_v2  ;;  %v507_v7 = vmul.f32 %v504_v6, %v504_v6  ;;  %v560_v8 = vld [vmem:[%s500_s27 + $0x8] sm:$0xff]  ;;  %v518_v13 = vrot.slane %v517_v12, 2  ;;  %s1752_s23 = sshra.s32 %s1196_s19, 4  ;;  %s1758_s22 = scalar_lea.hbm %s2206_s11, 32  ;;  %s1753_s23 = int_to_ptr.hbm [resolvable:$true] %s1752_s23 }
  0x45   : > { %563 = vperm.xlu1 %1597, %v559_v3   ;;  %s1754_s21 = scalar_lea.hbm %s1753_s23, 16  ;;  %p1759_p9 = scmp.lt.s32.totalorder %s1753_s23, %s2206_s11 }
  0x46   : > { %v509_v5 = vsel %vm508_vm0, %v506_v4, 0.0  ;;  %v512_v9 = vsel %vm508_vm0, %v507_v7, 0.0  ;;  %v519_v14 = vadd.f32 %v518_v13, %v517_v12  ;;  %p1755_p1 = scmp.ne.s32.totalorder %s1753_s23, %s1754_s21  ;;  %p1760_p2 = scmp.lt.s32.totalorder %s1758_s22, %s1754_s21 }
  0x47   : > { %510 = vadd.xlane.f32.xlu0 %v509_v5 }
  0x48   : > { %v520_v15 = vrot.slane %v519_v14, 1  ;;  %p1756_p4 = pnand %p1755_p1, %p1973_p3  ;;  %p1761_p10 = por %p1760_p2, %p1759_p9 }
  0x4a   : > { %v521_v17 = vadd.f32 %v520_v15, %v519_v14  ;;  %p1757_p11 = pneg %p1756_p4 }
  0x4c   : > { %1342 = vmatmul.msk.f32.gmra.mxu0 %vm508_vm0, %v504_v6  ;;  %p1762_p12 = pnand %p1761_p10, %p1757_p11 }
  0x4d   : > { %566 = vperm.xlu1 %1597, %v560_v8  }
  0x4f   : > { %513 = vadd.xlane.f32.xlu0 %v512_v9 }
  0xb7   : > { %v564_v21 = vpop.permute.xlu1 %563 }
  0xb8   : > { %vm569_vm1 = vcmp.eq.s32.totalorder %v564_v21, %v1599_v19 }
  0xba   : > { %v511_v16 = vpop.xlane.xlu0 %510 }
  0xbb   : > { %v551_v18 = vadd.f32 %v521_v17, %v511_v16 }
  0xbf   : > { %v567_v30 = vpop.permute.xlu1 %566 }
  0xc0   : > { %vm570_vm2 = vcmp.eq.s32.totalorder %v567_v30, %v1599_v19 }
  0xc1   : > { %v545_v20 = vpop.f32.mrf.mxu0 }
  0xc2   : > { %v553_v22 = vmul.f32 2.0, %v545_v20  ;;  %v514_v24 = vpop.xlane.xlu0 %513 }
  0xc3   : > { %v552_v27 = vadd.f32 %v521_v17, %v514_v24 }
  0xc4   : > { %v555_v23 = vsub.f32 %v551_v18, %v553_v22 }
  0xc6   : > { %v557_v25 = vmax.f32 %v555_v23, 0.0 }
  0xc8   : > { %v571_v26 = vsel %vm569_vm1, %v557_v25, inf }
  0xc9   : > { %v548_v28 = vpop.f32.mrf.mxu0  ;;  %575 = vmin.xlane.f32.xlu2 %v571_v26 }
  0xca   : > { %v554_v29 = vmul.f32 2.0, %v548_v28 }
  0xcc   : > { %v556_v31 = vsub.f32 %v552_v27, %v554_v29 }
  0xce   : > { %v558_v32 = vmax.f32 %v556_v31, 0.0 }
  0xd0   : > { %v572_v33 = vsel %vm570_vm2, %v558_v32, inf }
  0xd1   : > { %577 = vmin.xlane.f32.xlu2 %v572_v33 }
 0x13c   : > { %v576_v36 = vpop.xlane.xlu2 %575 }
 0x13d   : > { %vm579_vm3 = vcmp.eq.f32.partialorder %v571_v26, %v576_v36  ;;  %v613_v52 = vmax.f32 %v576_v36, 1e-16 }
 0x13e   : > { %v581_v37 = vsel %vm579_vm3, %v2038_v35, 128 }
 0x13f   : > { %v584_v38 = vshra.s32 %v581_v37, 16  ;;  %v583_v44 = vand.u32 65535, %v581_v37  ;;  %1602 = vrcp.f32 %v613_v52  ;;  %v626_v59 = vand.u32 2147483648, %v613_v52 }
 0x140   : > { %vm620_vm8 = vweird.f32 %v613_v52  ;;  %v624_v61 = vand.u32 2147483647, %v613_v52 }
 0x141   : > { %v586_v39 = vcvt.s32.f32 %v584_v38  ;;  %v585_v46 = vcvt.s32.f32 %v583_v44  ;;  %v627_v2 = vor.u32 1.1754944e-38, %v626_v59 }
 0x142   : > { %vm625_vm10 = vcmp.eq.f32.partialorder %v624_v61, 8.507059e+37 }
 0x143   : > { %587 = vmin.xlane.f32.xlu0 %v586_v39 }
 0x144   : > { %v2041_v40 = vpop.xlane.xlu2 %577 }
 0x145   : > { %vm580_vm4 = vcmp.eq.f32.partialorder %v572_v33, %v2041_v40  ;;  %v1603_v53 = vpop.eup %1602  ;;  %v614_v29 = vmax.f32 %v2041_v40, 1e-16 }
 0x146   : > { %v582_v41 = vsel %vm580_vm4, %v2038_v35, 128  ;;  %v616_v54 = vmul.f32 %v1603_v53, %v613_v52  ;;  %vm621_vm7 = vweird.f32 %v1603_v53 }
 0x147   : > { %v598_v42 = vshra.s32 %v582_v41, 16  ;;  %v597_v48 = vand.u32 65535, %v582_v41  ;;  %vm622_vm9 = vmor %vm620_vm8, %vm621_vm7  ;;  %vm635_vm8 = vweird.f32 %v614_v29 }
 0x148   : > { %v617_v55 = vsub.f32 1.0, %v616_v54 }
 0x149   : > { %v600_v43 = vcvt.s32.f32 %v598_v42  ;;  %v599_v50 = vcvt.s32.f32 %v597_v48 }
 0x14a   : > { %v618_v56 = vmul.f32 %v1603_v53, %v617_v55 }
 0x14b   : > { %601 = vmin.xlane.f32.xlu1 %v600_v43 }
 0x14c   : > { %v619_v58 = vadd.f32 %v1603_v53, %v618_v56 }
 0x14e   : > { %v623_v0 = vsel %vm622_vm9, %v1603_v53, %v619_v58 }
 0x14f   : > { %v2046_v4 = vsel %vm625_vm10, %v627_v2, %v623_v0  ;;  %v639_v0 = vand.u32 2147483647, %v614_v29 }
 0x1b6   : > { %v588_v45 = vpop.xlane.xlu0 %587 }
 0x1b7   : > { %vm589_vm5 = vcmp.eq.f32.partialorder %v586_v39, %v588_v45  ;;  %v594_v57 = vcvt.f32.s32 %v588_v45 }
 0x1b8   : > { %v590_v47 = vsel %vm589_vm5, %v585_v46, inf }
 0x1b9   : > { %591 = vmin.xlane.f32.xlu2 %v590_v47  ;;  %v595_v62 = vshll.u32 %v594_v57, 16 }
 0x1be   : > { %v602_v49 = vpop.xlane.xlu1 %601 }
 0x1bf   : > { %vm603_vm6 = vcmp.eq.f32.partialorder %v600_v43, %v602_v49  ;;  %v608_v3 = vcvt.f32.s32 %v602_v49 }
 0x1c0   : > { %v604_v51 = vsel %vm603_vm6, %v599_v50, inf }
 0x1c1   : > { %605 = vmin.xlane.f32.xlu0 %v604_v51  ;;  %v609_v8 = vshll.u32 %v608_v3, 16 }
 0x22c   : > { %v592_v60 = vpop.xlane.xlu2 %591 }
 0x22d   : > { %v593_v63 = vcvt.f32.s32 %v592_v60  ;;  %v641_v60 = vand.u32 2147483648, %v614_v29 }
 0x22f   : > { %v596_v1 = vadd.s32 %v595_v62, %v593_v63 }
 0x231   : > { %vm611_vm11 = vcmp.eq.s32.totalorder %v2038_v35, %v596_v1 }
 0x232   : > { %v2048_v5 = vsel %vm611_vm11, inf, %v571_v26  ;;  %v2051_v6 = vsel %vm611_vm11, %v2046_v4, 0.0 }
 0x233   : > { %653 = vmin.xlane.f32.xlu2 %v2048_v5 }
 0x234   : > { %v606_v7 = vpop.xlane.xlu0 %605 }
 0x235   : > { %v607_v9 = vcvt.f32.s32 %v606_v7 }
 0x237   : > { %v2054_v10 = vadd.s32 %v609_v8, %v607_v9  ;;  %v642_v9 = vor.u32 1.1754944e-38, %v641_v60  ;;  %v1484_v60 = vld [vmem:[%s2197_s2 + $0x18] sm:$0xff] }
 0x239   : > { %vm612_vm12 = vcmp.eq.s32.totalorder %v2038_v35, %v2054_v10 }
 0x23a   : > { %v2061_v11 = vsel %vm612_vm12, inf, %v572_v33 }
 0x23b   : > { %655 = vmin.xlane.f32.xlu0 %v2061_v11 }
 0x2a6   : > { %v654_v12 = vpop.xlane.xlu2 %653 }
 0x2a7   : > { %vm657_vm13 = vcmp.eq.f32.partialorder %v2048_v5, %v654_v12  ;;  %v691_v28 = vmax.f32 %v654_v12, 1e-16 }
 0x2a8   : > { %v659_v13 = vsel %vm657_vm13, %v2038_v35, 128  ;;  %vm640_vm13 = vcmp.eq.f32.partialorder %v639_v0, 8.507059e+37 }
 0x2a9   : > { %v662_v14 = vshra.s32 %v659_v13, 16  ;;  %v661_v20 = vand.u32 65535, %v659_v13  ;;  %1604 = vrcp.f32 %v691_v28  ;;  %v704_v45 = vand.u32 2147483648, %v691_v28 }
 0x2aa   : > { %1606 = vrcp.f32 %v614_v29  ;;  %vm698_vm2 = vweird.f32 %v691_v28  ;;  %v702_v40 = vand.u32 2147483647, %v691_v28 }
 0x2ab   : > { %v664_v15 = vcvt.s32.f32 %v662_v14  ;;  %v663_v22 = vcvt.s32.f32 %v661_v20  ;;  %v705_v53 = vor.u32 1.1754944e-38, %v704_v45 }
 0x2ac   : > { %vm703_vm5 = vcmp.eq.f32.partialorder %v702_v40, 8.507059e+37 }
 0x2ad   : > { %665 = vmin.xlane.f32.xlu2 %v664_v15 }
 0x2ae   : > { %v656_v16 = vpop.xlane.xlu0 %655 }
 0x2af   : > { %vm658_vm14 = vcmp.eq.f32.partialorder %v2061_v11, %v656_v16  ;;  %v692_v30 = vmax.f32 %v656_v16, 1e-16  ;;  %v1605_v31 = vpop.eup %1604 }
 0x2b0   : > { %v660_v17 = vsel %vm658_vm14, %v2038_v35, 128  ;;  %v694_v32 = vmul.f32 %v1605_v31, %v691_v28  ;;  %v1607_v33 = vpop.eup %1606  ;;  %vm699_vm1 = vweird.f32 %v1605_v31 }
 0x2b1   : > { %v676_v18 = vshra.s32 %v660_v17, 16  ;;  %v675_v24 = vand.u32 65535, %v660_v17  ;;  %1608 = vrcp.f32 %v692_v30  ;;  %v631_v37 = vmul.f32 %v1607_v33, %v614_v29  ;;  %vm700_vm3 = vmor %vm698_vm2, %vm699_vm1 }
 0x2b2   : > { %v695_v34 = vsub.f32 1.0, %v694_v32  ;;  %vm636_vm4 = vweird.f32 %v1607_v33  ;;  %v719_v62 = vand.u32 2147483648, %v692_v30  ;;  %vm713_vm10 = vweird.f32 %v692_v30 }
 0x2b3   : > { %v678_v19 = vcvt.s32.f32 %v676_v18  ;;  %v677_v26 = vcvt.s32.f32 %v675_v24  ;;  %v632_v41 = vsub.f32 1.0, %v631_v37  ;;  %vm2078_vm9 = vmor %vm635_vm8, %vm636_vm4  ;;  %v717_v2 = vand.u32 2147483647, %v692_v30 }
 0x2b4   : > { %v696_v39 = vmul.f32 %v1605_v31, %v695_v34  ;;  %v720_v12 = vor.u32 1.1754944e-38, %v719_v62 }
 0x2b5   : > { %679 = vmin.xlane.f32.xlu0 %v678_v19  ;;  %v633_v47 = vmul.f32 %v1607_v33, %v632_v41  ;;  %vm718_vm14 = vcmp.eq.f32.partialorder %v717_v2, 8.507059e+37 }
 0x2b6   : > { %v697_v43 = vadd.f32 %v1605_v31, %v696_v39 }
 0x2b7   : > { %v1609_v36 = vpop.eup %1608  ;;  %v634_v54 = vadd.f32 %v1607_v33, %v633_v47 }
 0x2b8   : > { %v709_v38 = vmul.f32 %v1609_v36, %v692_v30  ;;  %v701_v50 = vsel %vm700_vm3, %v1605_v31, %v697_v43  ;;  %vm714_vm7 = vweird.f32 %v1609_v36 }
 0x2b9   : > { %v2070_v56 = vsel %vm703_vm5, %v705_v53, %v701_v50  ;;  %vm715_vm11 = vmor %vm713_vm10, %vm714_vm7  ;;  %v638_v7 = vsel %vm2078_vm9, %v1607_v33, %v634_v54  ;;  %v1485_v53 = vld [vmem:[%s2197_s2 + $0x20] sm:$0xff] }
 0x2ba   : > { %v710_v44 = vsub.f32 1.0, %v709_v38  ;;  %v2084_v13 = vsel %vm640_vm13, %v642_v9, %v638_v7  ;;  %v727_v54 = vadd.f32 %v2070_v56, %v2046_v4  ;;  %v1483_v4 = vld [vmem:[%s2197_s2 + $0x10] sm:$0xff] }
 0x2bc   : > { %v711_v51 = vmul.f32 %v1609_v36, %v710_v44 }
 0x2be   : > { %v712_v59 = vadd.f32 %v1609_v36, %v711_v51 }
 0x2c0   : > { %v716_v8 = vsel %vm715_vm11, %v1609_v36, %v712_v59 }
 0x2c1   : > { %v2087_v14 = vsel %vm718_vm14, %v720_v12, %v716_v8  ;;  %v1496_v12 = vld [vmem:[#allocation5 + $0x38] sm:$0xff] }
 0x2c2   : > { %1071 = vmatpush.bf16.msra.mxu3 %v1496_v12 }
 0x320   : > { %v666_v21 = vpop.xlane.xlu2 %665 }
 0x321   : > { %vm667_vm15 = vcmp.eq.f32.partialorder %v664_v15, %v666_v21  ;;  %v672_v42 = vcvt.f32.s32 %v666_v21  ;;  %v646_v15 = vsel %vm612_vm12, %v2084_v13, 0.0 }
 0x322   : > { %v668_v23 = vsel %vm667_vm15, %v663_v22, inf }
 0x323   : > { %669 = vmin.xlane.f32.xlu2 %v668_v23  ;;  %v673_v48 = vshll.u32 %v672_v42, 16 }
 0x328   : > { %v680_v25 = vpop.xlane.xlu0 %679 }
 0x329   : > { %vm681_vm0 = vcmp.eq.f32.partialorder %v678_v19, %v680_v25  ;;  %v686_v55 = vcvt.f32.s32 %v680_v25 }
 0x32a   : > { %v682_v27 = vsel %vm681_vm0, %v677_v26, inf  ;;  %v1487_v26 = vld [vmem:[%s2197_s2 + $0x30] sm:$0xff] }
 0x32b   : > { %683 = vmin.xlane.f32.xlu0 %v682_v27  ;;  %v687_v3 = vshll.u32 %v686_v55, 16  ;;  %v1486_v27 = vld [vmem:[%s2197_s2 + $0x28] sm:$0xff] }
 0x396   : > { %v670_v46 = vpop.xlane.xlu2 %669 }
 0x397   : > { %v671_v49 = vcvt.f32.s32 %v670_v46 }
 0x399   : > { %v674_v52 = vadd.s32 %v673_v48, %v671_v49 }
 0x39b   : > { %vm689_vm6 = vcmp.eq.s32.totalorder %v2038_v35, %v674_v52 }
 0x39c   : > { %v729_v57 = vsel %vm689_vm6, inf, %v2048_v5  ;;  %v723_v58 = vsel %vm689_vm6, %v2070_v56, 0.0  ;;  %v728_v56 = vadd.f32 %v2087_v14, %v2084_v13  ;;  %v1504_v13 = vld [vmem:[#allocation7 + $0x30] sm:$0xff] }
 0x39d   : > { %731 = vmin.xlane.f32.xlu2 %v729_v57  ;;  %v2075_v61 = vadd.f32 %v723_v58, %v2051_v6 }
 0x39e   : > { %v684_v1 = vpop.xlane.xlu0 %683 }
 0x39f   : > { %v685_v5 = vcvt.f32.s32 %v684_v1 }
 0x3a1   : > { %v688_v6 = vadd.s32 %v687_v3, %v685_v5  ;;  %v1482_v3 = vld [vmem:[%s2197_s2 + $0x8] sm:$0xff]  ;;  %v1481_v5 = vld [vmem:[%s2197_s2] sm:$0xff] }
 0x3a3   : > { %vm690_vm15 = vcmp.eq.s32.totalorder %v2038_v35, %v688_v6  ;;  %v1505_v6 = vld [vmem:[#allocation7 + $0x38] sm:$0xff] }
 0x3a4   : > { %v730_v16 = vsel %vm690_vm15, inf, %v2061_v11  ;;  %v724_v17 = vsel %vm690_vm15, %v2087_v14, 0.0  ;;  %v1488_v11 = vld [vmem:[%s2197_s2 + $0x38] sm:$0xff]  ;;  %1009 = vmatpush.bf16.msra.mxu2 %v1505_v6  ;;  %v1495_v14 = vld [vmem:[#allocation5 + $0x30] sm:$0xff] }
 0x3a5   : > { %733 = vmin.xlane.f32.xlu0 %v730_v16  ;;  %v2095_v18 = vadd.f32 %v724_v17, %v646_v15  ;;  %906 = vmatpush.bf16.msra.mxu1 %v1488_v11  ;;  %v1503_v17 = vld [vmem:[#allocation7 + $0x28] sm:$0xff] }
 0x3a6   : > { %1072 = vmatpush.bf16.msra.mxu3 %v1495_v14 }
 0x3a8   : > { %1010 = vmatpush.bf16.msra.mxu2 %v1504_v13  ;;  %v1600_v13 = vld [vmem:[%s2203_s8] ss:$0 sm:$0xff] }
 0x3a9   : > { %907 = vmatpush.bf16.msra.mxu1 %v1487_v26 }
 0x3ac   : > { %1011 = vmatpush.bf16.msra.mxu2 %v1503_v17 }
 0x3ad   : > { %908 = vmatpush.bf16.msra.mxu1 %v1486_v27 }
 0x3b1   : > { %909 = vmatpush.bf16.msra.mxu1 %v1485_v53 }
 0x3b5   : > { %910 = vmatpush.bf16.msra.mxu1 %v1484_v60  ;;  %v1497_v60 = vld [vmem:[%s2007_s9] sm:$0xff] }
 0x3b9   : > { %911 = vmatpush.bf16.msra.mxu1 %v1483_v4 }
 0x3bd   : > { %912 = vmatpush.bf16.msra.mxu1 %v1482_v3  ;;  %v1509_v3 = vld [vmem:[#allocation8 + $0x18] sm:$0xff] }
 0x3c1   : > { %913 = vmatpush.bf16.msra.mxu1 %v1481_v5  ;;  %v1508_v5 = vld [vmem:[#allocation8 + $0x10] sm:$0xff] }
 0x410   : > { %v732_v19 = vpop.xlane.xlu2 %731 }
 0x411   : > { %vm735_vm0 = vcmp.eq.f32.partialorder %v729_v57, %v732_v19  ;;  %v769_v37 = vmax.f32 %v732_v19, 1e-16  ;;  %v1494_v19 = vld [vmem:[#allocation5 + $0x28] sm:$0xff] }
 0x412   : > { %v737_v20 = vsel %vm735_vm0, %v2038_v35, 128  ;;  %1073 = vmatpush.bf16.msra.mxu3 %v1494_v19 }
 0x413   : > { %v740_v21 = vshra.s32 %v737_v20, 16  ;;  %v739_v28 = vand.u32 65535, %v737_v20  ;;  %1610 = vrcp.f32 %v769_v37  ;;  %v782_v47 = vand.u32 2147483648, %v769_v37 }
 0x414   : > { %vm776_vm4 = vweird.f32 %v769_v37  ;;  %v780_v48 = vand.u32 2147483647, %v769_v37 }
 0x415   : > { %v742_v22 = vcvt.s32.f32 %v740_v21  ;;  %v741_v30 = vcvt.s32.f32 %v739_v28  ;;  %v783_v51 = vor.u32 1.1754944e-38, %v782_v47 }
 0x416   : > { %vm781_vm6 = vcmp.eq.f32.partialorder %v780_v48, 8.507059e+37 }
 0x417   : > { %743 = vmin.xlane.f32.xlu2 %v742_v22 }
 0x418   : > { %v734_v23 = vpop.xlane.xlu0 %733 }
 0x419   : > { %vm736_vm1 = vcmp.eq.f32.partialorder %v730_v16, %v734_v23  ;;  %v770_v38 = vmax.f32 %v734_v23, 1e-16  ;;  %v1611_v39 = vpop.eup %1610  ;;  %v1502_v23 = vld [vmem:[#allocation7 + $0x20] sm:$0xff] }
 0x41a   : > { %v738_v24 = vsel %vm736_vm1, %v2038_v35, 128  ;;  %v772_v41 = vmul.f32 %v1611_v39, %v769_v37  ;;  %vm777_vm3 = vweird.f32 %v1611_v39  ;;  %1012 = vmatpush.bf16.msra.mxu2 %v1502_v23  ;;  %v1601_v23 = vld [vmem:[%s2205_s10] ss:$0 sm:$0xff] }
 0x41b   : > { %v754_v10 = vshra.s32 %v738_v24, 16  ;;  %v753_v32 = vand.u32 65535, %v738_v24  ;;  %1612 = vrcp.f32 %v770_v38  ;;  %vm778_vm5 = vmor %vm776_vm4, %vm777_vm3  ;;  %v797_v57 = vand.u32 2147483648, %v770_v38 }
 0x41c   : > { %v773_v42 = vsub.f32 1.0, %v772_v41  ;;  %vm791_vm8 = vweird.f32 %v770_v38  ;;  %v795_v59 = vand.u32 2147483647, %v770_v38 }
 0x41d   : > { %v756_v25 = vcvt.s32.f32 %v754_v10  ;;  %v755_v34 = vcvt.s32.f32 %v753_v32  ;;  %v798_v63 = vor.u32 1.1754944e-38, %v797_v57  ;;  %v1493_v10 = vld [vmem:[#allocation5 + $0x20] sm:$0xff]  ;;  %v1501_v32 = vld [vmem:[#allocation7 + $0x18] sm:$0xff] }
 0x41e   : > { %v774_v45 = vmul.f32 %v1611_v39, %v773_v42  ;;  %vm796_vm10 = vcmp.eq.f32.partialorder %v795_v59, 8.507059e+37  ;;  %1074 = vmatpush.bf16.msra.mxu3 %v1493_v10  ;;  %1013 = vmatpush.bf16.msra.mxu2 %v1501_v32  ;;  %v1500_v42 = vld [vmem:[#allocation7 + $0x10] sm:$0xff] }
 0x41f   : > { %757 = vmin.xlane.f32.xlu1 %v756_v25  ;;  %v1491_v59 = vld [vmem:[#allocation5 + $0x10] sm:$0xff] }
 0x420   : > { %v775_v40 = vadd.f32 %v1611_v39, %v774_v45 }
 0x421   : > { %v1613_v43 = vpop.eup %1612 }
 0x422   : > { %v787_v44 = vmul.f32 %v1613_v43, %v770_v38  ;;  %v779_v49 = vsel %vm778_vm5, %v1611_v39, %v775_v40  ;;  %vm792_vm7 = vweird.f32 %v1613_v43  ;;  %1014 = vmatpush.bf16.msra.mxu2 %v1500_v42 }
 0x423   : > { %v2114_v52 = vsel %vm781_vm6, %v783_v51, %v779_v49  ;;  %vm793_vm9 = vmor %vm791_vm8, %vm792_vm7 }
 0x424   : > { %v788_v46 = vsub.f32 1.0, %v787_v44  ;;  %v805_v58 = vadd.f32 %v2114_v52, %v727_v54 }
 0x426   : > { %v789_v50 = vmul.f32 %v1613_v43, %v788_v46  ;;  %v807_v0 = vmax.f32 %v805_v58, 1e-16  ;;  %v1498_v58 = vld [vmem:[#allocation7] sm:$0xff] }
 0x428   : > { %v790_v55 = vadd.f32 %v1613_v43, %v789_v50  ;;  %1614 = vrcp.f32 %v807_v0  ;;  %v820_v28 = vand.u32 2147483648, %v807_v0  ;;  %vm814_vm13 = vweird.f32 %v807_v0 }
 0x42a   : > { %v794_v62 = vsel %vm793_vm9, %v1613_v43, %v790_v55  ;;  %v821_v39 = vor.u32 1.1754944e-38, %v820_v28 }
 0x42b   : > { %v2125_v1 = vsel %vm796_vm10, %v798_v63, %v794_v62  ;;  %v1490_v62 = vld [vmem:[#allocation5 + $0x8] sm:$0xff]  ;;  %v1513_v63 = vld [vmem:[#allocation8 + $0x38] sm:$0xff] }
 0x42c   : > { %v806_v2 = vadd.f32 %v2125_v1, %v728_v56  ;;  %1162 = vmatpush.bf16.msrb.mxu0 %v1513_v63  ;;  %v1511_v56 = vld [vmem:[#allocation8 + $0x28] sm:$0xff] }
 0x42e   : > { %v2139_v7 = vmax.f32 %v806_v2, 1e-16  ;;  %v1615_v8 = vpop.eup %1614  ;;  %v1510_v2 = vld [vmem:[#allocation8 + $0x20] sm:$0xff] }
 0x42f   : > { %v810_v9 = vmul.f32 %v1615_v8, %v807_v0  ;;  %vm815_vm11 = vweird.f32 %v1615_v8 }
 0x430   : > { %1616 = vrcp.f32 %v2139_v7  ;;  %vm816_vm14 = vmor %vm814_vm13, %vm815_vm11  ;;  %v835_v47 = vand.u32 2147483648, %v2139_v7  ;;  %v833_v49 = vand.u32 2147483647, %v2139_v7 }
 0x431   : > { %v811_v15 = vsub.f32 1.0, %v810_v9 }
 0x432   : > { %vm834_vm4 = vcmp.eq.f32.partialorder %v833_v49, 8.507059e+37 }
 0x433   : > { %v812_v21 = vmul.f32 %v1615_v8, %v811_v15 }
 0x435   : > { %v813_v26 = vadd.f32 %v1615_v8, %v812_v21 }
 0x436   : > { %v1617_v16 = vpop.eup %1616 }
 0x437   : > { %vm830_vm1 = vweird.f32 %v1617_v16 }
 0x48a   : > { %v2108_v29 = vpop.xlane.xlu2 %743 }
 0x48b   : > { %vm745_vm12 = vcmp.eq.f32.partialorder %v742_v22, %v2108_v29  ;;  %v750_v20 = vcvt.f32.s32 %v2108_v29  ;;  %v825_v22 = vmul.f32 %v1617_v16, %v2139_v7  ;;  %v1492_v29 = vld [vmem:[#allocation5 + $0x18] sm:$0xff] }
 0x48c   : > { %v746_v31 = vsel %vm745_vm12, %v741_v30, inf  ;;  %1075 = vmatpush.bf16.msra.mxu3 %v1492_v29  ;;  %vm829_vm12 = vweird.f32 %v2139_v7  ;;  %v1507_v7 = vld [vmem:[#allocation8 + $0x8] sm:$0xff] }
 0x48d   : > { %747 = vmin.xlane.f32.xlu0 %v746_v31  ;;  %v826_v27 = vsub.f32 1.0, %v825_v22  ;;  %v818_v31 = vand.u32 2147483647, %v807_v0  ;;  %v1512_v0 = vld [vmem:[#allocation8 + $0x30] sm:$0xff] }
 0x48e   : > { %1163 = vmatpush.bf16.msrb.mxu0 %v1512_v0 }
 0x48f   : > { %v827_v37 = vmul.f32 %v1617_v16, %v826_v27  ;;  %vm819_vm0 = vcmp.eq.f32.partialorder %v818_v31, 8.507059e+37 }
 0x490   : > { %1076 = vmatpush.bf16.msra.mxu3 %v1491_v59 }
 0x491   : > { %v828_v40 = vadd.f32 %v1617_v16, %v827_v37 }
 0x492   : > { %v2111_v33 = vpop.xlane.xlu1 %757  ;;  %1164 = vmatpush.bf16.msrb.mxu0 %v1511_v56 }
 0x493   : > { %vm759_vm2 = vcmp.eq.f32.partialorder %v756_v25, %v2111_v33  ;;  %v751_v25 = vshll.u32 %v750_v20, 16 }
 0x494   : > { %v760_v36 = vsel %vm759_vm2, %v755_v34, inf  ;;  %v764_v34 = vcvt.f32.s32 %v2111_v33  ;;  %vm831_vm2 = vmor %vm829_vm12, %vm830_vm1  ;;  %1077 = vmatpush.bf16.msra.mxu3 %v1490_v62 }
 0x495   : > { %761 = vmin.xlane.f32.xlu2 %v760_v36  ;;  %v817_v36 = vsel %vm816_vm14, %v1615_v8, %v813_v26  ;;  %v832_v50 = vsel %vm831_vm2, %v1617_v16, %v828_v40  ;;  %v1506_v8 = vld [vmem:[#allocation8] sm:$0xff] }
 0x496   : > { %v822_v44 = vsel %vm819_vm0, %v821_v39, %v817_v36  ;;  %v765_v45 = vshll.u32 %v764_v34, 16  ;;  %1165 = vmatpush.bf16.msrb.mxu0 %v1510_v2 }
 0x49a   : > { %1166 = vmatpush.bf16.msrb.mxu0 %v1509_v3 }
 0x49e   : > { %1167 = vmatpush.bf16.msrb.mxu0 %v1508_v5 }
 0x4a2   : > { %1168 = vmatpush.bf16.msrb.mxu0 %v1507_v7 }
 0x4a6   : > { %1169 = vmatpush.bf16.msrb.mxu0 %v1506_v8 }
 0x500   : > { %v748_v24 = vpop.xlane.xlu0 %747 }
 0x501   : > { %v749_v11 = vcvt.f32.s32 %v748_v24 }
 0x503   : > { %v752_v30 = vadd.s32 %v751_v25, %v749_v11 }
 0x505   : > { %vm767_vm15 = vcmp.eq.s32.totalorder %v2038_v35, %v752_v30 }
 0x506   : > { %v801_v38 = vsel %vm767_vm15, %v2114_v52, 0.0  ;;  %v836_v52 = vor.u32 1.1754944e-38, %v835_v47 }
 0x507   : > { %v803_v41 = vadd.f32 %v801_v38, %v2075_v61  ;;  %v1499_v61 = vld [vmem:[#allocation7 + $0x8] sm:$0xff] }
 0x508   : > { %v762_v43 = vpop.xlane.xlu2 %761  ;;  %1015 = vmatpush.bf16.msra.mxu2 %v1499_v61  ;;  %v837_v54 = vsel %vm834_vm4, %v836_v52, %v832_v50 }
 0x509   : > { %v763_v46 = vcvt.f32.s32 %v762_v43  ;;  %v839_v33 = vmul.f32 %v822_v44, %v803_v41 }
 0x50b   : > { %v766_v48 = vadd.s32 %v765_v45, %v763_v46 }
 0x50c   : > { %1016 = vmatpush.bf16.msra.mxu2 %v1498_v58 }
 0x50d   : > { %vm768_vm3 = vcmp.eq.s32.totalorder %v2038_v35, %v766_v48  ;;  %v1489_v35 = vld [vmem:[#allocation5] sm:$0xff] }
 0x50e   : > { %v802_v51 = vsel %vm768_vm3, %v2125_v1, 0.0  ;;  %1078 = vmatpush.bf16.msra.mxu3 %v1489_v35 }
 0x50f   : > { %v804_v53 = vadd.f32 %v802_v51, %v2095_v18  ;;  %1017 = vmatmul.bf16.vlgmr.msra.gmra.mxu2 %v1497_v60 }
 0x511   : > { %v840_v55 = vmul.f32 %v837_v54, %v804_v53 }
 0x513   : > { %v841_v57 = vpack.c.bf16 %v840_v55, %v839_v33 }
 0x515   : > { %914 = vmatmul.bf16.vlgmr.msra.gmra.mxu1 %v841_v57 }
 0x592   : > { %v915_v18 = vpop.f32.mrf.mxu1  ;;  %v1018_v9 = vpop.f32.mrf.mxu2 }
 0x59a   : > { %v917_v1 = vpop.f32.mrf.mxu1  ;;  %v1020_v14 = vpop.f32.mrf.mxu2 }
 0x59b   : > { %v920_v4 = vpack.c.bf16 %v917_v1, %v915_v18 }
 0x59d   : > { %1079 = vmatmul.bf16.vlgmr.msra.gmra.mxu3 %v920_v4 }
 0x620   : > { %v1080_v6 = vpop.f32.mrf.mxu3 }
 0x621   : > { %v1081_v12 = vadd.f32 %v1080_v6, %v1018_v9 }
 0x623   : > { %v1089_v16 = vadd.f32 %v1600_v13, %v1081_v12 }
 0x625   : > { %v1091_v20 = vmax.f32 %v1089_v16, 0.0 }
 0x628   : > { %v1082_v15 = vpop.f32.mrf.mxu3 }
 0x629   : > { %v1083_v17 = vadd.f32 %v1082_v15, %v1020_v14 }
 0x62b   : > { %v1090_v19 = vadd.f32 %v1600_v13, %v1083_v17 }
 0x62d   : > { %v1092_v21 = vmax.f32 %v1090_v19, 0.0 }
 0x62f   : > { %v1093_v22 = vpack.c.bf16 %v1092_v21, %v1091_v20 }
 0x631   : > { %1170 = vmatmul.bf16.vlgmr.msrb.gmra.mxu0 %v1093_v22 }
 0x6ae   : > { %v1171_v24 = vpop.f32.mrf.mxu0 }
 0x6af   : > { %v1172_v10 = vadd.f32 %v1601_v23, %v1171_v24 }
 0x6b1   : > { %v1176_v25 = vmax.f32 %v1172_v10, 0.0 }
 0x6b3   : > { %1178 = vst [vmem:[%s488_s25] sm:$0xff] %v1176_v25 }
 0x6b6   : > { %v1173_v11 = vpop.f32.mrf.mxu0 }
 0x6b7   : > { %v1174_v26 = vadd.f32 %v1601_v23, %v1173_v11 }
 0x6b9   : > { %v1177_v27 = vmax.f32 %v1174_v26, 0.0 }
 0x6bb   : > { %1179 = vst [vmem:[%s488_s25 + $0x8] sm:$0xff] %v1177_v27 }
 0x6bc   : > { %1765 = shalt.err (!%p1762_p12)
}
 0x6bd   : > { %s1820_s7 = smov 128   ;;  %s1821_s12 = smov 8  }
 0x6be   : > { %1529 = dma.vmem_to_hbm [thread:$0]  (%p1973_p3), %s1194_s13, 256, %s1196_s19, %s1181_s28, %s1820_s7, %s1820_s7, %s1821_s12  }
 0x6bf PF: > { %s1210_s27 = sand.u32 1, %s1800_s17   ;;  %p2228_p13 = scmp.ge.s32.totalorder %s1812_s20, 2 }
 0x6c0   : > { %s1211_s14 = scalar_lea.sflag [#allocation4], %s1210_s27 }
 0x6c1   : > { %p1546_p0 = pnand %p2228_p13, %p1917_p6 }
 0x6c3   : > { %p1547_p5 = pneg %p1546_p0 }
 0x6c5   : > { %1795 = dma.done.wait (%p1547_p5), %s1211_s14, 256  }
 0x6c6   : > { %1797 = vsyncadd (%p1547_p5), %s1211_s14, 4294967040  ;;  %s2229_s26 = sld [smem:[#allocation15_spill]]  ;;  %p26_p7 = scmp.ge.s32.totalorder %s1955_s6, 4  }
 0x6c7   : > { %s2230_s19 = sld [smem:[#allocation16_spill]]  ;;  %s2231_s17 = smov %s1804_s18 }
 0x6c8   : > { %s2233_s20 = smov %s1955_s6  ;;  %28 = sbr.rel (!%p26_p7) target bundleno = 11 (0xb), region = 127 }
 0x6cc   : > { %s2232_s18 = smov %s2229_s26 }
 0x6cd   :  { %1217 = vsyncpa [#allocation3], 1 }
 0x6ce   :  { %1219 = vsyncpa [#allocation3 + $0x1], 1 }
 0x6cf   :  { %1220 = vsyncpa [#allocation6], 1 }
 0x6d0   :  { %1221 = vsyncpa [#allocation9], 1 }
 0x6d1   :  { %1222 = vsyncpa [#allocation4], 1 }
 0x6d2   :  { %1224 = vsyncpa [#allocation4 + $0x1], 1 }

</bundles_post_ra>
